<compile_context>
chip_gen: v5e
topology: v5e:2x2
jax: 0.10.0
libtpu: 0.0.40
codegen_flags: <defaults>
</compile_context>

<pallas_src>
import functools

import jax
import jax.numpy as jnp
from jax import lax
from jax.experimental import pallas as pl
from jax.experimental.pallas import tpu as pltpu


def _bilinear_attention_kernel(qwc_ref, doc_ref, out_ref, *, H):
    # qwc_ref: [tile_n * H, 1]        (question @ W), column layout
    # doc_ref: [tile_m, tile_n * H]   document tile in its ORIGINAL HBM layout
    # out_ref: [M, tile_n]            resident across the M-tile axis
    tile_m, K = doc_ref.shape          # K == tile_n * H
    tile_n = out_ref.shape[1]
    mi = pl.program_id(1)

    # Block-diagonal weight: wblk[k, c] = qw[k] if (k // H) == c else 0.
    # Built from 2-D iotas + elementwise ops only (no relayouts); cost is
    # O(tile_n^2 * H) VPU ops per step, negligible next to the doc DMA.
    k_idx = lax.broadcasted_iota(jnp.int32, (K, tile_n), 0)
    c_lo = lax.broadcasted_iota(jnp.int32, (K, tile_n), 1) * H
    in_block = (k_idx >= c_lo) & (k_idx < c_lo + H)
    wblk = jnp.where(in_block, qwc_ref[...], 0.0)            # [K, tile_n], f32

    doc = doc_ref[...]
    if doc.dtype == jnp.bfloat16:
        # MXU consumes bf16 natively with f32 accumulation -> no upcast copy.
        wblk = wblk.astype(jnp.bfloat16)
    elif doc.dtype != jnp.float32:
        doc = doc.astype(jnp.float32)

    # scores[m, n] = sum_h doc[m, n, h] * qw[n, h]   -- one MXU matmul,
    # no transposes or cross-lane reduces anywhere.
    scores = jnp.dot(doc, wblk, preferred_element_type=jnp.float32)  # [tile_m, tile_n]

    # Stage raw scores into the resident output block.
    row0 = pl.multiple_of(mi * tile_m, tile_m)
    out_ref[pl.ds(row0, tile_m), :] = scores

    # After the last M-tile: numerically stable softmax over the doc-seq axis
    # (dim 0 of the PyTorch output), in place over the resident block.
    @pl.when(mi == pl.num_programs(1) - 1)
    def _():
        s = out_ref[...]                                     # [M, tile_n] f32
        s_max = jnp.max(s, axis=0, keepdims=True)
        e = jnp.exp(s - s_max)
        denom = jnp.sum(e, axis=0, keepdims=True)
        inv = pl.reciprocal(denom, approx=True)              # EUP slot
        inv = inv * (2.0 - denom * inv)                      # one Newton step -> ~f32 exact
        out_ref[...] = e * inv


def _vmem_capacity_bytes():
    # Generation-aware: v5e/v6e have 128 MiB physical VMEM, v7x has 64 MiB.
    try:
        return int(pltpu.get_tpu_info().vmem_capacity_bytes)
    except Exception:
        return 64 * 1024 * 1024  # conservative (v7x-sized) fallback


def _choose_tiles(M, N, H, doc_itemsize, budget):
    """Pick (tile_n, tile_m): every BlockSpec dim is either the full dim or
    (8,128)-aligned, the per-step VMEM footprint fits `budget`, and (when N is
    big enough) the parallel batch axis keeps >= 2 grid steps for megacore."""

    def fits(tn, tm):
        K = tn * H
        need = (2 * tm * K * doc_itemsize      # doc tile, double-buffered
                + 2 * K * 4                    # qw column tile
                + 4 * M * tn * 4               # resident out block + softmax temps
                + 4 * K * tn * 4               # block-diag weight + build temps
                + tm * tn * 4)                 # matmul result
        return need <= budget

    # Batch-tile candidates: cap at 128 so the block-diag matmul keeps <= 128
    # output columns (a single MXU weight pass per 128-lane chunk).
    tn_cands = [t for t in range(128, 7, -8)
                if t < N and N % t == 0 and (t * H) % 128 == 0]
    if N <= 128:
        tn_cands = [N] + tn_cands
    if not tn_cands:
        tn_cands = [N]  # TODO(synk): pad the batch axis instead of a whole-N tile.
    if N >= 16:
        # Prefer >= 2 steps on the "parallel" axis (v7x megacore sharding).
        tn_cands = ([t for t in tn_cands if t <= N // 2]
                    + [t for t in tn_cands if t > N // 2])

    tm_cands = [M] + [t for t in range(2048, 7, -8) if t < M and M % t == 0]

    for tn in tn_cands:
        for tm in tm_cands:
            if fits(tn, tm):
                return tn, tm
    # TODO(synk): spill path for extreme shapes (huge H or huge M*tile_n).
    return tn_cands[-1], tm_cands[-1]


def bilinear_attention(question, context_matrix, document):
    M, N, H = document.shape
    assert question.shape == (N, H)
    assert context_matrix.shape == (H, H)

    # Fold the tiny [N,H]x[H,H] projection into the wrapper: removes the
    # per-step recompute and the resident [H,H] W block from VMEM entirely.
    qw = jnp.dot(question.astype(jnp.float32),
                 context_matrix.astype(jnp.float32),
                 precision=lax.Precision.HIGHEST)            # [N, H] f32
    # Column layout so the kernel can lane-broadcast it into the block-diagonal
    # weight without any in-kernel relayout.  (Tiny: N*H*4 bytes.)
    qw_col = qw.reshape(N * H, 1)

    # Metadata-only reshape: the document keeps its original HBM layout; the
    # flattened (n, h) axis becomes the lane axis (lane-dense even for H < 128).
    doc2 = document.reshape(M, N * H)

    cap = _vmem_capacity_bytes()
    vmem_limit = min((3 * cap) // 4, 100 * 1024 * 1024)
    budget = (4 * vmem_limit) // 5

    tile_n, tile_m = _choose_tiles(M, N, H, doc2.dtype.itemsize, budget)
    grid = (N // tile_n, M // tile_m)

    cost = pl.CostEstimate(
        flops=2 * M * N * H * tile_n + 6 * M * N,
        transcendentals=M * N,
        bytes_accessed=(document.size * document.dtype.itemsize
                        + N * H * 4
                        + M * N * 4),
    )

    kernel = functools.partial(_bilinear_attention_kernel, H=H)
    out = pl.pallas_call(
        kernel,
        out_shape=jax.ShapeDtypeStruct((M, N), jnp.float32),
        grid=grid,
        in_specs=[
            pl.BlockSpec((tile_n * H, 1), lambda ni, mi: (ni, 0)),       # qw column
            pl.BlockSpec((tile_m, tile_n * H), lambda ni, mi: (mi, ni)),  # document
        ],
        # Output block is revisited across the (trailing, "arbitrary") M axis and
        # only written back to HBM after the final softmax.
        out_specs=pl.BlockSpec((M, tile_n), lambda ni, mi: (0, ni)),
        compiler_params=pltpu.CompilerParams(
            dimension_semantics=("parallel", "arbitrary"),
            vmem_limit_bytes=vmem_limit,
        ),
        cost_estimate=cost,
    )(qw_col, doc2)

    return out  # [M, N], matching the PyTorch module


def bilinear_attention_ref(question, context_matrix, document):
    # Pure-JAX reference mirroring the PyTorch einsums + softmax(dim=0).
    dc = jnp.einsum('qh,mnh->mnq', context_matrix, document,
                    precision=lax.Precision.HIGHEST)
    att = jnp.einsum('nh,mnh->mn', question, dc,
                     precision=lax.Precision.HIGHEST)
    return jax.nn.softmax(att, axis=0)


if __name__ == "__main__":
    # Small shapes consistent with the module's forward contract.
    M = 8    # doc_seq_length
    N = 2    # batch_size
    H = 32   # input_size

    key = jax.random.PRNGKey(0)
    k_w, k_q, k_d = jax.random.split(key, 3)

    context_matrix = jax.random.normal(k_w, (H, H), dtype=jnp.float32)
    question = jax.random.normal(k_q, (N, H), dtype=jnp.float32)
    document = jax.random.normal(k_d, (M, N, H), dtype=jnp.float32)

    out = bilinear_attention(question, context_matrix, document)
    out = jax.block_until_ready(out)

    ref = bilinear_attention_ref(question, context_matrix, document)
    assert out.shape == (M, N)
    assert jnp.allclose(out, ref, atol=2e-4, rtol=1e-3), "mismatch vs reference"

    print("KERNEL_OK")
</pallas_src>

<mosaic_0001>
module attributes {stable_mosaic.version = 11 : i64} {
  func.func @_bilinear_attention_kernel(%arg0: i32, %arg1: i32, %arg2: memref<64x1xf32, #tpu.memory_space<vmem>>, %arg3: memref<8x64xf32, #tpu.memory_space<vmem>>, %arg4: memref<8x2xf32, #tpu.memory_space<vmem>>) attributes {dimension_semantics = [#tpu.dimension_semantics<parallel>, #tpu.dimension_semantics<arbitrary>], iteration_bounds = array<i64: 1, 1>, scalar_prefetch = 0 : i64, scratch_operands = 0 : i64, tpu.core_type = #tpu.core_type<tc>, window_params = [{transform_indices = @transform_0, window_bounds = array<i64: 64, 1>}, {transform_indices = @transform_1, window_bounds = array<i64: 8, 64>}, {transform_indices = @transform_2, window_bounds = array<i64: 8, 2>}]} {
    %0 = tpu.iota {dimensions = array<i32: 0>} : vector<64x2xi32>
    %1 = tpu.iota {dimensions = array<i32: 1>} : vector<64x2xi32>
    %c32_i32 = arith.constant 32 : i32
    %2 = vector.broadcast %c32_i32 : i32 to vector<64x2xi32>
    %3 = arith.muli %1, %2 : vector<64x2xi32>
    %4 = arith.cmpi sge, %0, %3 : vector<64x2xi32>
    %c32_i32_0 = arith.constant 32 : i32
    %5 = vector.broadcast %c32_i32_0 : i32 to vector<64x2xi32>
    %6 = arith.addi %3, %5 : vector<64x2xi32>
    %7 = arith.cmpi slt, %0, %6 : vector<64x2xi32>
    %8 = arith.andi %4, %7 : vector<64x2xi1>
    %c0 = arith.constant 0 : index
    %c0_1 = arith.constant 0 : index
    %9 = vector.load %arg2[%c0, %c0_1] : memref<64x1xf32, #tpu.memory_space<vmem>>, vector<64x1xf32>
    %cst = arith.constant 0.000000e+00 : f32
    %10 = vector.shape_cast %9 : vector<64x1xf32> to vector<64x1xf32>
    %11 = vector.broadcast %10 : vector<64x1xf32> to vector<64x2xf32>
    %12 = vector.broadcast %cst : f32 to vector<64x2xf32>
    %13 = arith.select %8, %11, %12 : vector<64x2xi1>, vector<64x2xf32>
    %c0_2 = arith.constant 0 : index
    %c0_3 = arith.constant 0 : index
    %14 = vector.load %arg3[%c0_2, %c0_3] : memref<8x64xf32, #tpu.memory_space<vmem>>, vector<8x64xf32>
    %cst_4 = arith.constant dense<0.000000e+00> : vector<8x2xf32>
    %15 = tpu.matmul %14, %13, %cst_4 {dimension_numbers = #tpu.dot_dimension_numbers<[1], [0], [0], [1], [0, 0, 1, 1], [], []>} : vector<8x64xf32>, vector<64x2xf32>, vector<8x2xf32> -> vector<8x2xf32>
    %c8_i32 = arith.constant 8 : i32
    %16 = arith.muli %arg1, %c8_i32 : i32
    %17 = tpu.assume_multiple %16, 8 : i32
    %18 = arith.index_cast %17 : i32 to index
    %c0_5 = arith.constant 0 : index
    %19 = vector.load %arg4[%18, %c0_5] : memref<8x2xf32, #tpu.memory_space<vmem>>, vector<8x2xf32>
    tpu.vector_store %arg4[%18, %c0_5], %15 {strides = array<i32>} : memref<8x2xf32, #tpu.memory_space<vmem>>, vector<8x2xf32>,
    %c0_i32 = arith.constant 0 : i32
    %20 = arith.cmpi eq, %arg1, %c0_i32 : i32
    %21 = arith.extui %20 : i1 to i32
    %c0_i32_6 = arith.constant 0 : i32
    %22 = arith.cmpi ne, %21, %c0_i32_6 : i32
    scf.if %22 {
      %c0_7 = arith.constant 0 : index
      %c0_8 = arith.constant 0 : index
      %23 = vector.load %arg4[%c0_7, %c0_8] : memref<8x2xf32, #tpu.memory_space<vmem>>, vector<8x2xf32>
      %cst_9 = arith.constant dense<0xFF800000> : vector<2xf32>
      %24 = vector.multi_reduction <maximumf>, %23, %cst_9 [0] : vector<8x2xf32> to vector<2xf32>
      %25 = vector.shape_cast %24 : vector<2xf32> to vector<1x2xf32>
      %26 = vector.broadcast %25 : vector<1x2xf32> to vector<8x2xf32>
      %27 = arith.subf %23, %26 : vector<8x2xf32>
      %28 = math.exp %27 : vector<8x2xf32>
      %cst_10 = arith.constant dense<0.000000e+00> : vector<2xf32>
      %29 = vector.multi_reduction <add>, %28, %cst_10 [0] : vector<8x2xf32> to vector<2xf32>
      %30 = vector.shape_cast %29 : vector<2xf32> to vector<1x2xf32>
      %31 = tpu.reciprocal %30 {approx = true} : vector<1x2xf32> -> vector<1x2xf32>
      %32 = arith.mulf %30, %31 : vector<1x2xf32>
      %cst_11 = arith.constant 2.000000e+00 : f32
      %33 = vector.broadcast %cst_11 : f32 to vector<1x2xf32>
      %34 = arith.subf %33, %32 : vector<1x2xf32>
      %35 = arith.mulf %31, %34 : vector<1x2xf32>
      %36 = vector.broadcast %35 : vector<1x2xf32> to vector<8x2xf32>
      %37 = arith.mulf %28, %36 : vector<8x2xf32>
      %c0_12 = arith.constant 0 : index
      %c0_13 = arith.constant 0 : index
      %38 = vector.load %arg4[%c0_12, %c0_13] : memref<8x2xf32, #tpu.memory_space<vmem>>, vector<8x2xf32>
      tpu.vector_store %arg4[%c0_12, %c0_13], %37 {strides = array<i32>} : memref<8x2xf32, #tpu.memory_space<vmem>>, vector<8x2xf32>,
    } else {
    }
    return
  }
  func.func @transform_0(%arg0: i32, %arg1: i32) -> (i32, i32) {
    %c0_i32 = arith.constant 0 : i32
    %c0_i32_0 = arith.constant 0 : i32
    return %arg0, %c0_i32 : i32, i32
  }
  func.func @transform_1(%arg0: i32, %arg1: i32) -> (i32, i32) {
    %c0_i32 = arith.constant 0 : i32
    return %arg1, %arg0 : i32, i32
  }
  func.func @transform_2(%arg0: i32, %arg1: i32) -> (i32, i32) {
    %c0_i32 = arith.constant 0 : i32
    %c0_i32_0 = arith.constant 0 : i32
    return %c0_i32, %arg0 : i32, i32
  }
}

</mosaic_0001>

<bundles_post_ra>
// kernel: tpu_custom_call.1
= control target key start
LH: loop header
LB: loop body
LE: loop exit
PB: predicated region body
PF: predicated region fallthrough
CT: control target
= control target key end

     0   :  { %v182_v0 = vmov 0   ;;  %v11_v9 = vlaneseq  ;;  %s238_s0 = inlined_call_operand.vmem [shape: f32[64,1], index: 0, kind: input, shape index: {}]   ;;  %s239_s1 = inlined_call_operand.vmem [shape: f32[8,64], index: 1, kind: input, shape index: {}]   ;;  %s240_s2 = inlined_call_operand.vmem [shape: f32[8,2], index: 2, kind: output, shape index: {}]  }
   0x1   :  { %176 = vset.pattern.permute.xlu1 %v182_v0  ;;  %175 = vset.pattern.permute.xlu0 %v182_v0  ;;  %v55_v1 = vld [vmem:[%s238_s0 + $0x38] sm:$0xff]  ;;  %v53_v2 = vld [vmem:[%s238_s0 + $0x28] sm:$0xff]  ;;  %v54_v4 = vld [vmem:[%s238_s0 + $0x30] sm:$0xff] }
   0x2   :  { %93 = vperm.xlu0 %175, %v55_v1   ;;  %83 = vperm.xlu1 %176, %v53_v2   ;;  %v51_v3 = vld [vmem:[%s238_s0 + $0x18] sm:$0xff]  ;;  %v52_v5 = vld [vmem:[%s238_s0 + $0x20] sm:$0xff]  ;;  %v50_v6 = vld [vmem:[%s238_s0 + $0x10] sm:$0xff]  ;;  %v21_v10 = vand.u32 127, %v11_v9  ;;  %v12_v11 = vshrl.u32 %v11_v9, 7 }
   0x3   :  { %177 = vset.pattern.permute.xlu2 %v182_v0  ;;  %v49_v7 = vld [vmem:[%s238_s0 + $0x8] sm:$0xff]  ;;  %v48_v8 = vld [vmem:[%s238_s0] sm:$0xff] }
   0x4   :  { %73 = vperm.xlu2 %177, %v51_v3   ;;  %v22_v12 = vmul.u32 32, %v21_v10  ;;  %v19_v13 = vadd.s32 56, %v12_v11  ;;  %v18_v15 = vadd.s32 48, %v12_v11  ;;  %v17_v18 = vadd.s32 40, %v12_v11  ;;  %v104_v28 = vld [vmem:[%s239_s1] sm:$0xff] }
   0x5   :  { %v16_v19 = vadd.s32 32, %v12_v11  ;;  %v15_v20 = vadd.s32 24, %v12_v11  ;;  %v14_v22 = vadd.s32 16, %v12_v11  ;;  %v13_v24 = vadd.s32 8, %v12_v11 }
   0x6   :  { %v31_v14 = vadd.s32 32, %v22_v12  ;;  %vm30_vm0 = vcmp.ge.s32.totalorder %v19_v13, %v22_v12  ;;  %vm29_vm3 = vcmp.ge.s32.totalorder %v18_v15, %v22_v12  ;;  %vm28_vm5 = vcmp.ge.s32.totalorder %v17_v18, %v22_v12 }
   0x7   :  { %vm27_vm8 = vcmp.ge.s32.totalorder %v16_v19, %v22_v12  ;;  %vm26_vm11 = vcmp.ge.s32.totalorder %v15_v20, %v22_v12  ;;  %vm25_vm14 = vcmp.ge.s32.totalorder %v14_v22, %v22_v12 }
   0x8   :  { %vm39_vm1 = vcmp.lt.s32.totalorder %v19_v13, %v31_v14  ;;  %vm38_vm4 = vcmp.lt.s32.totalorder %v18_v15, %v31_v14  ;;  %vm37_vm6 = vcmp.lt.s32.totalorder %v17_v18, %v31_v14  ;;  %vm36_vm9 = vcmp.lt.s32.totalorder %v16_v19, %v31_v14 }
   0x9   :  { %vm47_vm2 = vmand %vm30_vm0, %vm39_vm1  ;;  %vm35_vm12 = vcmp.lt.s32.totalorder %v15_v20, %v31_v14  ;;  %vm34_vm15 = vcmp.lt.s32.totalorder %v14_v22, %v31_v14  ;;  %vm24_vm1 = vcmp.ge.s32.totalorder %v13_v24, %v22_v12 }
   0xa   :  { %88 = vperm.xlu0 %175, %v54_v4   ;;  %78 = vperm.xlu1 %176, %v52_v5   ;;  %vm46_vm7 = vmand %vm29_vm3, %vm38_vm4  ;;  %vm23_vm4 = vcmp.ge.s32.totalorder %v12_v11, %v22_v12 }
   0xb   :  { %vm45_vm10 = vmand %vm28_vm5, %vm37_vm6  ;;  %vm32_vm5 = vcmp.lt.s32.totalorder %v12_v11, %v31_v14 }
   0xc   :  { %68 = vperm.xlu2 %177, %v50_v6   ;;  %vm44_vm13 = vmand %vm27_vm8, %vm36_vm9  ;;  %vm105_vm8 = vcmask 523264   ;;  %vm131_vm9 = vcmask 15360  }
   0xd   :  { %vm43_vm0 = vmand %vm26_vm11, %vm35_vm12 }
   0xe   :  { %vm42_vm3 = vmand %vm25_vm14, %vm34_vm15 }
  0x12   :  { %63 = vperm.xlu0 %175, %v49_v7   ;;  %58 = vperm.xlu1 %176, %v48_v8  }
  0x5e   :  { %v74_v21 = vpop.permute.xlu2 %73 }
  0x66   :  { %v69_v26 = vpop.permute.xlu2 %68 }
  0x74   :  { %v94_v16 = vpop.permute.xlu0 %93  ;;  %v84_v17 = vpop.permute.xlu1 %83 }
  0x75   :  { %165 = vmatpush.msk.msra.mxu0 %vm47_vm2, %v94_v16  ;;  %vm33_vm2 = vcmp.lt.s32.totalorder %v13_v24, %v31_v14 }
  0x76   :  { %vm41_vm6 = vmand %vm24_vm1, %vm33_vm2 }
  0x7c   :  { %v89_v23 = vpop.permute.xlu0 %88  ;;  %v79_v25 = vpop.permute.xlu1 %78 }
  0x7d   :  { %166 = vmatpush.msk.msra.mxu0 %vm46_vm7, %v89_v23  ;;  %vm40_vm7 = vmand %vm23_vm4, %vm32_vm5 }
  0x7f   :  { %167 = vmatpush.msk.msra.mxu0 %vm45_vm10, %v84_v17 }
  0x81   :  { %168 = vmatpush.msk.msra.mxu0 %vm44_vm13, %v79_v25 }
  0x83   :  { %169 = vmatpush.msk.msra.mxu0 %vm43_vm0, %v74_v21 }
  0x84   :  { %v64_v27 = vpop.permute.xlu0 %63  ;;  %v59_v29 = vpop.permute.xlu1 %58 }
  0x85   :  { %170 = vmatpush.msk.msra.mxu0 %vm42_vm3, %v69_v26 }
  0x87   :  { %171 = vmatpush.msk.msra.mxu0 %vm41_vm6, %v64_v27 }
  0x89   :  { %172 = vmatpush.msk.msra.mxu0 %vm40_vm7, %v59_v29 }
  0x8a   :  { %173 = vmatmul.msk.f32.vlgmr.msra.gmra.mxu0 %vm105_vm8, %v104_v28 }
 0x107   :  { %v126_v30 = vpop.f32.mrf.mxu0 }
 0x108   :  { %132 = vst.msk [vmem:[%s240_s2] sm:$0xff] %vm131_vm9, %v126_v30 }
 0x10f   :  { %v137_v31 = vld [vmem:[%s240_s2] sm:$0xff] }
 0x110   :  { %v138_v32 = vsel %vm131_vm9, %v137_v31, -inf }
 0x111   :  { %v139_v33 = vrot.slane %v138_v32, 4 }
 0x113   :  { %v140_v34 = vmax.f32 %v138_v32, %v139_v33 }
 0x115   :  { %v141_v35 = vrot.slane %v140_v34, 2 }
 0x117   :  { %v142_v36 = vmax.f32 %v140_v34, %v141_v35 }
 0x119   :  { %v143_v37 = vrot.slane %v142_v36, 1 }
 0x11b   :  { %v144_v38 = vmax.f32 %v142_v36, %v143_v37 }
 0x11d   :  { %v145_v39 = vsub.f32 %v137_v31, %v144_v38 }
 0x11f   :  { %v146_v40 = vmul.f32 1.442695, %v145_v39 }
 0x121   :  { %178 = vpow2.f32 %v146_v40 }
 0x127   :  { %v179_v41 = vpop.eup %178 }
 0x128   :  { %v148_v42 = vsel %vm131_vm9, %v179_v41, 0.0 }
 0x129   :  { %v149_v43 = vrot.slane %v148_v42, 4 }
 0x12b   :  { %v150_v44 = vadd.f32 %v149_v43, %v148_v42 }
 0x12d   :  { %v151_v45 = vrot.slane %v150_v44, 2 }
 0x12f   :  { %v152_v46 = vadd.f32 %v151_v45, %v150_v44 }
 0x131   :  { %v153_v47 = vrot.slane %v152_v46, 1 }
 0x133   :  { %v154_v48 = vadd.f32 %v153_v47, %v152_v46 }
 0x135   :  { %180 = vrcp.f32 %v154_v48 }
 0x13b   :  { %v181_v49 = vpop.eup %180 }
 0x13c   :  { %v156_v50 = vmul.f32 %v181_v49, %v154_v48 }
 0x13e   :  { %v157_v51 = vsub.f32 2.0, %v156_v50 }
 0x140   :  { %v158_v52 = vmul.f32 %v181_v49, %v157_v51 }
 0x142   :  { %v159_v53 = vmul.f32 %v179_v41, %v158_v52 }
 0x144   :  { %160 = vst.msk [vmem:[%s240_s2] sm:$0xff] %vm131_vm9, %v159_v53 }

</bundles_post_ra>
